<compile_context>
chip_gen: v5e
topology: v5e:2x2
jax: 0.10.0
libtpu: 0.0.40
codegen_flags: <defaults>
</compile_context>

<pallas_src>
import functools
import math

import jax
import jax.numpy as jnp
from jax.experimental import pallas as pl
from jax.experimental.pallas import tpu as pltpu


# ----------------------------- Pallas kernel --------------------------------

def _linear_kernel(x_ref, w_ref, b_ref, o_ref, acc_ref):
    """out[i] = sum_k x[i,k] @ w[k] + b, accumulated in an f32 VMEM scratch."""
    k = pl.program_id(1)

    @pl.when(k == 0)
    def _():
        acc_ref[...] = jnp.zeros_like(acc_ref)

    acc_ref[...] += jnp.dot(x_ref[...], w_ref[...],
                            preferred_element_type=jnp.float32)

    @pl.when(k == pl.num_programs(1) - 1)
    def _():
        o_ref[...] = (acc_ref[...] + b_ref[...]).astype(o_ref.dtype)


def _round_up(x, m):
    return (x + m - 1) // m * m


def _single_buffered_spec(block_shape, index_map):
    """BlockSpec for grid-invariant operands: single buffer (saves VMEM)."""
    try:
        return pl.BlockSpec(block_shape, index_map,
                            pipeline_mode=pl.Buffered(1))
    except (AttributeError, TypeError):
        # Older jax without pipeline_mode / Buffered: fall back to default.
        return pl.BlockSpec(block_shape, index_map)


def pallas_linear(x2d, w_kf, bias_row, *, compute_dtype=jnp.bfloat16,
                  out_dtype=None, tm=512, tk_chunk=1024,
                  vmem_budget_bytes=24 << 20, vmem_limit_bytes=32 << 20):
    """x2d: (M, K), w_kf: (K, F), bias_row: (1, F) -> (M, F) in out_dtype.

    Tiles over M ("parallel", >=2 steps when M allows for v7x megacore) and,
    only when the full-K weight doesn't fit the VMEM budget, over K
    ("arbitrary") with an f32 VMEM accumulator.  MXU inputs in compute_dtype
    (bf16 default); accumulation and bias-add stay f32; output cast on store.
    """
    M, K = x2d.shape
    Kw, F = w_kf.shape
    assert K == Kw and bias_row.shape == (1, F)
    if out_dtype is None:
        out_dtype = compute_dtype

    in_b = jnp.dtype(compute_dtype).itemsize
    out_b = jnp.dtype(out_dtype).itemsize

    # Lane-dense output: pad F to a multiple of 128 (else masked vst).
    F_pad = _round_up(F, 128)

    # M tile: big for bandwidth, but >=2 grid steps when M allows (v7x shards
    # the "parallel" axis across its 2 TensorCores); multiple of 16 for bf16
    # sublane packing.
    if M >= 32:
        TM = min(tm, _round_up(M // 2, 16))
    else:
        TM = _round_up(M, 8)

    def vmem_est(tm_, tk_, w_bufs):
        return (w_bufs * tk_ * F_pad * in_b        # weight
                + 2 * tm_ * tk_ * in_b             # x (double-buffered)
                + F_pad * 4                        # bias (f32, single)
                + 2 * tm_ * F_pad * out_b          # out (double-buffered)
                + tm_ * F_pad * 4)                 # f32 accumulator

    # K tiling: prefer the whole K resident (weight fetched from HBM once,
    # single-buffered); otherwise stream K in 128-aligned chunks.
    full_k = False
    TK = K
    K_pad = K
    for tm_try in sorted({t for t in (TM, 256, 128) if t <= TM}, reverse=True):
        if vmem_est(tm_try, K, w_bufs=1) <= vmem_budget_bytes:
            TM, TK, K_pad, full_k = tm_try, K, K, True
            break
    if not full_k:
        K_pad = _round_up(K, 128)
        TK = 128
        t = 128
        while t <= min(tk_chunk, K_pad):
            if K_pad % t == 0:
                TK = t
            t += 128
        while TM > 128 and vmem_est(TM, TK, w_bufs=2) > vmem_budget_bytes:
            TM //= 2

    # Zero-pad only where required for correctness:
    #   * K (contraction axis) when K is streamed in chunks,
    #   * F to keep the output lane-dense.
    # M is never padded: the ragged last M tile reads unspecified rows that
    # only feed output rows which Pallas masks on store.
    x_p = x2d.astype(compute_dtype)          # no-op when already cast upstream
    if K_pad != K:
        x_p = jnp.pad(x_p, ((0, 0), (0, K_pad - K)))
    w_p = w_kf.astype(compute_dtype)
    if (K_pad, F_pad) != (K, F):
        w_p = jnp.pad(w_p, ((0, K_pad - K), (0, F_pad - F)))
    b_p = bias_row.astype(jnp.float32)
    if F_pad != F:
        b_p = jnp.pad(b_p, ((0, 0), (0, F_pad - F)))

    grid = (pl.cdiv(M, TM), K_pad // TK)

    if full_k:
        w_spec = _single_buffered_spec((TK, F_pad), lambda i, k: (0, 0))
    else:
        w_spec = pl.BlockSpec((TK, F_pad), lambda i, k: (k, 0))
    b_spec = _single_buffered_spec((1, F_pad), lambda i, k: (0, 0))

    out = pl.pallas_call(
        _linear_kernel,
        out_shape=jax.ShapeDtypeStruct((M, F_pad), out_dtype),
        grid_spec=pltpu.PrefetchScalarGridSpec(
            num_scalar_prefetch=0,
            grid=grid,
            in_specs=[
                pl.BlockSpec((TM, TK), lambda i, k: (i, k)),
                w_spec,
                b_spec,
            ],
            out_specs=pl.BlockSpec((TM, F_pad), lambda i, k: (i, 0)),
            scratch_shapes=[pltpu.VMEM((TM, F_pad), jnp.float32)],
        ),
        compiler_params=pltpu.CompilerParams(
            dimension_semantics=("parallel", "arbitrary"),
            vmem_limit_bytes=vmem_limit_bytes),
    )(x_p, w_p, b_p)

    if F_pad != F:
        out = out[:, :F]
    return out


# ------------------------------ Layout glue ----------------------------------

def window2image(msa_output):
    # Exact port of the PyTorch helper (reference / fallback path only).
    bs, num_windows, num_patch_in_window, patch_depth = msa_output.shape
    window_size = int(math.sqrt(num_patch_in_window))
    sw = int(math.sqrt(num_windows))
    H = W = sw * window_size
    x = msa_output.reshape(bs, sw, sw, window_size, window_size, patch_depth)
    x = jnp.transpose(x, (0, 1, 3, 2, 4, 5))
    x = x.reshape(bs, H * W, patch_depth)
    x = jnp.transpose(x, (0, 2, 1))
    return x.reshape(bs, patch_depth, H, W)  # NCHW, like the PyTorch code


def _unfold_nonoverlap(img, m):
    # F.unfold(kernel_size=m, stride=m) for NCHW, channel order (c, ki, kj).
    # Only used for the pure-JAX reference in __main__.
    bs, c, H, W = img.shape
    oh, ow = H // m, W // m
    t = img.reshape(bs, c, oh, m, ow, m)
    t = jnp.transpose(t, (0, 1, 3, 5, 2, 4))          # (bs, c, ki, kj, oh, ow)
    return t.reshape(bs, c * m * m, oh * ow)


def merge_windows_channels_last(x, m, dtype=None):
    """(bs, nw, npw, d) -> (bs, L, m*m*d) with K ordered (ki, kj, c).

    Same gather as window2image + F.unfold + transpose, but with the channel
    permutation folded into the weight (see PatchMerging.__init__), so a
    single activation transpose suffices.  The cast to `dtype` (bf16) is done
    here so XLA fuses transpose+cast into one pass.
    """
    bs, nw, npw, d = x.shape
    sw = int(math.sqrt(nw))
    ws = int(math.sqrt(npw))
    if ws % m == 0:
        wsm = ws // m
        # (bs, wr, wc, prh, ki, pcw, kj, d)
        t = x.reshape(bs, sw, sw, wsm, m, wsm, m, d)
        # -> (bs, wr, prh, wc, pcw, ki, kj, d): the one unavoidable transpose.
        t = jnp.transpose(t, (0, 1, 3, 2, 5, 4, 6, 7))
        out = t.reshape(bs, (sw * wsm) * (sw * wsm), m * m * d)
    else:
        # Fallback when merge cells cross window boundaries: go through NCHW.
        img = window2image(x)
        bs_, dd, H, W = img.shape
        oh, ow = H // m, W // m
        t = img.reshape(bs_, dd, oh, m, ow, m)
        t = jnp.transpose(t, (0, 2, 4, 3, 5, 1))      # (bs, oh, ow, ki, kj, c)
        out = t.reshape(bs_, oh * ow, m * m * dd)
    if dtype is not None and out.dtype != dtype:
        out = out.astype(dtype)
    return out


# ------------------------------ PatchMerging ----------------------------------

def _patch_merging_forward(x, w_kf, b_row, *, merge_size, compute_dtype,
                           out_dtype):
    merged = merge_windows_channels_last(x, merge_size, dtype=compute_dtype)
    bs, L, K = merged.shape
    out2d = pallas_linear(merged.reshape(bs * L, K), w_kf, b_row,
                          compute_dtype=compute_dtype, out_dtype=out_dtype)
    return out2d.reshape(bs, L, -1)


class PatchMerging:
    def __init__(self, model_dim, merge_size, output_depth_scale=0.5, key=None,
                 compute_dtype=jnp.bfloat16, out_dtype=None):
        self.merge_size = merge_size
        self.compute_dtype = compute_dtype
        self.out_dtype = compute_dtype if out_dtype is None else out_dtype
        in_f = model_dim * merge_size * merge_size
        out_f = int(model_dim * merge_size * merge_size * output_depth_scale)
        if key is None:
            key = jax.random.PRNGKey(0)
        kw, kb = jax.random.split(key)
        # Deterministic nn.Linear-like init; canonical PyTorch layout (F, K).
        bound = 1.0 / math.sqrt(in_f)
        self.weight = jax.random.uniform(kw, (out_f, in_f), jnp.float32,
                                         minval=-bound, maxval=bound)
        self.bias = jax.random.uniform(kb, (out_f,), jnp.float32,
                                       minval=-bound, maxval=bound)
        # Fold F.unfold's (c, ki, kj) ordering into the weight ONCE and
        # pre-transpose to (K, F); bias pre-shaped (1, F).  The activation then
        # stays channels-last ((ki, kj, c)) and skips the NCHW round-trip.
        m, d = merge_size, model_dim
        w_nat = jnp.transpose(self.weight.reshape(out_f, d, m, m), (0, 2, 3, 1))
        self._w_kf = jnp.transpose(w_nat.reshape(out_f, in_f), (1, 0))  # (K,F) f32
        self._b_row = self.bias[None, :]                                # (1,F) f32
        # Pre-cast the weight once (avoids a per-call f32->bf16 weight pass).
        self._w_kf_c = self._w_kf.astype(self.compute_dtype)
        self._fwd = jax.jit(functools.partial(
            _patch_merging_forward, merge_size=merge_size,
            compute_dtype=self.compute_dtype, out_dtype=self.out_dtype))

    def __call__(self, x):
        return self._fwd(x, self._w_kf_c, self._b_row)


# ---------------------------------- main --------------------------------------

if __name__ == "__main__":
    key = jax.random.PRNGKey(0)
    k_in, k_param, k_in2 = jax.random.split(key, 3)

    # ---- Case 1: bs=2, 2x2 windows of 4x4 patches, model_dim=4, merge=2
    #      -> image 8x8, L=16, K=16, F=8, M=32.
    bs, num_window, num_patch_in_window, model_dim = 2, 4, 16, 4
    merge_size = 2

    x = jax.random.normal(
        k_in, (bs, num_window, num_patch_in_window, model_dim), jnp.float32)

    module = PatchMerging(model_dim, merge_size, output_depth_scale=0.5,
                          key=k_param)
    out = jax.block_until_ready(module(x))

    # Pure-JAX reference with the ORIGINAL PyTorch ordering
    # (window2image -> unfold (c,ki,kj) -> transpose -> x @ W.T + b).
    merged_pt = jnp.transpose(
        _unfold_nonoverlap(window2image(x), merge_size), (0, 2, 1))
    ref = merged_pt @ module.weight.T + module.bias
    assert out.shape == ref.shape, (out.shape, ref.shape)

    # Exact structural check: same kernel, f32 compute + f32 output.
    K = module._w_kf.shape[0]
    out_f32 = pallas_linear(
        merge_windows_channels_last(x, merge_size).reshape(-1, K),
        module._w_kf, module._b_row,
        compute_dtype=jnp.float32, out_dtype=jnp.float32,
    ).reshape(ref.shape)
    out_f32 = jax.block_until_ready(out_f32)
    assert jnp.allclose(out_f32, ref, atol=1e-5, rtol=1e-5), "f32 mismatch vs reference"

    # Default path (bf16 MXU inputs, f32 accumulate/bias, bf16 output).
    assert jnp.allclose(out.astype(jnp.float32), ref, atol=5e-2, rtol=5e-2), \
        "bf16 mismatch vs reference"

    # ---- Case 2: ragged M (grid does not divide M) — 3x3 windows, bs=1
    #      -> image 12x12, L=36, M=36, TM=32 => ragged last M tile.
    x2 = jax.random.normal(k_in2, (1, 9, 16, model_dim), jnp.float32)
    out2 = jax.block_until_ready(module(x2))
    merged_pt2 = jnp.transpose(
        _unfold_nonoverlap(window2image(x2), merge_size), (0, 2, 1))
    ref2 = merged_pt2 @ module.weight.T + module.bias
    assert out2.shape == ref2.shape, (out2.shape, ref2.shape)

    out2_f32 = pallas_linear(
        merge_windows_channels_last(x2, merge_size).reshape(-1, K),
        module._w_kf, module._b_row,
        compute_dtype=jnp.float32, out_dtype=jnp.float32,
    ).reshape(ref2.shape)
    out2_f32 = jax.block_until_ready(out2_f32)
    assert jnp.allclose(out2_f32, ref2, atol=1e-5, rtol=1e-5), "ragged-M f32 mismatch"
    assert jnp.allclose(out2.astype(jnp.float32), ref2, atol=5e-2, rtol=5e-2), \
        "ragged-M bf16 mismatch"

    print("KERNEL_OK")
</pallas_src>

<mosaic_0001>
module attributes {stable_mosaic.version = 11 : i64} {
  func.func @_linear_kernel(%arg0: i32, %arg1: i32, %arg2: memref<16x16xbf16, #tpu.memory_space<vmem>>, %arg3: memref<16x128xbf16, #tpu.memory_space<vmem>>, %arg4: memref<1x128xf32, #tpu.memory_space<vmem>>, %arg5: memref<16x128xbf16, #tpu.memory_space<vmem>>, %arg6: memref<16x128xf32, #tpu.memory_space<vmem>>) attributes {dimension_semantics = [#tpu.dimension_semantics<parallel>, #tpu.dimension_semantics<arbitrary>], iteration_bounds = array<i64: 2, 1>, scalar_prefetch = 0 : i64, scratch_operands = 1 : i64, tpu.core_type = #tpu.core_type<tc>, window_params = [{transform_indices = @transform_0, window_bounds = array<i64: 16, 16>}, {pipeline_mode = #tpu.pipeline_mode<synchronous>, transform_indices = @transform_1, window_bounds = array<i64: 16, 128>}, {pipeline_mode = #tpu.pipeline_mode<synchronous>, transform_indices = @transform_2, window_bounds = array<i64: 1, 128>}, {transform_indices = @transform_3, window_bounds = array<i64: 16, 128>}]} {
    %c0_i32 = arith.constant 0 : i32
    %0 = arith.cmpi eq, %arg1, %c0_i32 : i32
    %1 = arith.extui %0 : i1 to i32
    %c0_i32_0 = arith.constant 0 : i32
    %2 = arith.cmpi ne, %1, %c0_i32_0 : i32
    scf.if %2 {
      %cst_10 = arith.constant 0.000000e+00 : f32
      %12 = vector.broadcast %cst_10 : f32 to vector<16x128xf32>
      %c0_11 = arith.constant 0 : index
      %c0_12 = arith.constant 0 : index
      %13 = vector.load %arg6[%c0_11, %c0_12] : memref<16x128xf32, #tpu.memory_space<vmem>>, vector<16x128xf32>
      tpu.vector_store %arg6[%c0_11, %c0_12], %12 {strides = array<i32>} : memref<16x128xf32, #tpu.memory_space<vmem>>, vector<16x128xf32>,
    } else {
    }
    %c0 = arith.constant 0 : index
    %c0_1 = arith.constant 0 : index
    %3 = vector.load %arg6[%c0, %c0_1] : memref<16x128xf32, #tpu.memory_space<vmem>>, vector<16x128xf32>
    %c0_2 = arith.constant 0 : index
    %c0_3 = arith.constant 0 : index
    %4 = vector.load %arg2[%c0_2, %c0_3] : memref<16x16xbf16, #tpu.memory_space<vmem>>, vector<16x16xbf16>
    %c0_4 = arith.constant 0 : index
    %c0_5 = arith.constant 0 : index
    %5 = vector.load %arg3[%c0_4, %c0_5] : memref<16x128xbf16, #tpu.memory_space<vmem>>, vector<16x128xbf16>
    %cst = arith.constant dense<0.000000e+00> : vector<16x128xf32>
    %6 = tpu.matmul %4, %5, %cst {dimension_numbers = #tpu.dot_dimension_numbers<[1], [0], [0], [1], [0, 0, 1, 1], [], []>} : vector<16x16xbf16>, vector<16x128xbf16>, vector<16x128xf32> -> vector<16x128xf32>
    %7 = arith.addf %3, %6 : vector<16x128xf32>
    %c0_6 = arith.constant 0 : index
    %c0_7 = arith.constant 0 : index
    %8 = vector.load %arg6[%c0_6, %c0_7] : memref<16x128xf32, #tpu.memory_space<vmem>>, vector<16x128xf32>
    tpu.vector_store %arg6[%c0_6, %c0_7], %7 {strides = array<i32>} : memref<16x128xf32, #tpu.memory_space<vmem>>, vector<16x128xf32>,
    %c0_i32_8 = arith.constant 0 : i32
    %9 = arith.cmpi eq, %arg1, %c0_i32_8 : i32
    %10 = arith.extui %9 : i1 to i32
    %c0_i32_9 = arith.constant 0 : i32
    %11 = arith.cmpi ne, %10, %c0_i32_9 : i32
    scf.if %11 {
      %c0_10 = arith.constant 0 : index
      %c0_11 = arith.constant 0 : index
      %12 = vector.load %arg6[%c0_10, %c0_11] : memref<16x128xf32, #tpu.memory_space<vmem>>, vector<16x128xf32>
      %c0_12 = arith.constant 0 : index
      %c0_13 = arith.constant 0 : index
      %13 = vector.load %arg4[%c0_12, %c0_13] : memref<1x128xf32, #tpu.memory_space<vmem>>, vector<1x128xf32>
      %14 = vector.broadcast %13 : vector<1x128xf32> to vector<16x128xf32>
      %15 = arith.addf %12, %14 : vector<16x128xf32>
      %16 = arith.truncf %15 : vector<16x128xf32> to vector<16x128xbf16>
      %c0_14 = arith.constant 0 : index
      %c0_15 = arith.constant 0 : index
      %17 = vector.load %arg5[%c0_14, %c0_15] : memref<16x128xbf16, #tpu.memory_space<vmem>>, vector<16x128xbf16>
      tpu.vector_store %arg5[%c0_14, %c0_15], %16 {strides = array<i32>} : memref<16x128xbf16, #tpu.memory_space<vmem>>, vector<16x128xbf16>,
    } else {
    }
    return
  }
  func.func @transform_0(%arg0: i32, %arg1: i32) -> (i32, i32) {
    %c0_i32 = arith.constant 0 : i32
    return %arg0, %arg1 : i32, i32
  }
  func.func @transform_1(%arg0: i32, %arg1: i32) -> (i32, i32) {
    %c0_i32 = arith.constant 0 : i32
    %c0_i32_0 = arith.constant 0 : i32
    %c0_i32_1 = arith.constant 0 : i32
    return %c0_i32, %c0_i32_0 : i32, i32
  }
  func.func @transform_2(%arg0: i32, %arg1: i32) -> (i32, i32) {
    %c0_i32 = arith.constant 0 : i32
    %c0_i32_0 = arith.constant 0 : i32
    %c0_i32_1 = arith.constant 0 : i32
    return %c0_i32, %c0_i32_0 : i32, i32
  }
  func.func @transform_3(%arg0: i32, %arg1: i32) -> (i32, i32) {
    %c0_i32 = arith.constant 0 : i32
    %c0_i32_0 = arith.constant 0 : i32
    return %arg0, %c0_i32 : i32, i32
  }
}

</mosaic_0001>

<bundles_post_ra>
// kernel: _patch_merging_forward.1
= control target key start
LH: loop header
LB: loop body
LE: loop exit
PB: predicated region body
PF: predicated region fallthrough
CT: control target
= control target key end

     0   :  { %s422_s12 = smov 0   ;;  %s424_s13 = smov 0   ;;  %s458_s0 = inlined_call_operand.vmem [shape: bf16[32,16], index: 0, kind: input, shape index: {}]   ;;  %s459_s1 = inlined_call_operand.vmem [shape: bf16[16,128], index: 1, kind: input, shape index: {}]   ;;  %s460_s2 = inlined_call_operand.vmem [shape: f32[1,128], index: 2, kind: input, shape index: {}]   ;;  %s461_s3 = inlined_call_operand.vmem [shape: bf16[32,128], index: 3, kind: output, shape index: {}]  }
   0x1   :  { %s426_s14 = smov 0  }
   0x2 LB: > { %s25_s15 = sadd.s32 1, %s396_s13  ;;  %p330_p0 = scmp.ge.s32.totalorder %s400_s14, 1  ;;  %s400_s14 = sphi %s426_s14, %s13_s14   ;;  %s396_s13 = sphi %s424_s13, %s463_s13   ;;  %s392_s12 = sphi %s422_s12, %s462_s12  }
   0x3   : > { %p27_p1 = scmp.ge.s32.totalorder %s25_s15, 2  ;;  %p155_p2 = scmp.lt.s32.totalorder %s400_s14, 3 }
   0x5   : > { %s465_s15 = smov (%p27_p1, %s25_s15), 0  ;;  %p156_p3 = pnand %p330_p0, %p155_p2 }
   0x6   : > { %s331_s18 = sshll.u32 (!%p156_p3), %s392_s12, 1 }
   0x7   : > { %159 = sbr.rel (%p156_p3) target bundleno = 155 (0x9b), region = 32  ;;  %p183_p4 = scmp.lt.s32.totalorder (!%p156_p3), %s331_s18, 3 }
   0xc   : > { %v347_v0 = vld [vmem:[%s459_s1] sm:$0xff]  ;;  %s467_s18 = smov (!%p183_p4, %s331_s18), 3  ;;  %vm221_vm0 = vcmask 130048  }
   0xd   : > { %232 = vmatpush.bf16.msra.mxu0 %v347_v0  ;;  %s332_s19 = sshll.u32 %s467_s18, 2  ;;  %v377_v3 = vld [vmem:[%s460_s2] ss:$0 sm:$0xff] }
   0xe   : > { %s189_s22 = scalar_lea.vmem %s458_s0, %s332_s19  ;;  %s195_s27 = scalar_lea.vmem %s461_s3, %s332_s19 }
   0xf   : > { %v346_v1 = vld [vmem:[%s189_s22] sm:$0xff] }
  0x10   : > { %343 = vmatmul.msk.bf16.vlgmr.msra.gmra.mxu0 %vm221_vm0, %v346_v1 }
  0x8d   : > { %v234_v2 = vpop.f32.mrf.mxu0 }
  0x8e   : > { %v252_v5 = vadd.f32 %v377_v3, %v234_v2 }
  0x95   : > { %v236_v4 = vpop.f32.mrf.mxu0 }
  0x96   : > { %v253_v6 = vadd.f32 %v377_v3, %v236_v4 }
  0x98   : > { %v351_v7 = vpack.c.bf16 %v253_v6, %v252_v5 }
  0x9a   : > { %352 = vst [vmem:[%s195_s27] sm:$0xff] %v351_v7  }
  0x9b PF: > { %s13_s14 = sadd.s32 1, %s400_s14   ;;  %s462_s12 = smov %s396_s13 }
  0x9c   : > { %p10_p5 = scmp.ge.s32.totalorder %s13_s14, 4   ;;  %s463_s13 = smov %s465_s15 }
  0x9e   :  { %12 = sbr.rel (!%p10_p5) target bundleno = 2 (0x2), region = 70 }

</bundles_post_ra>
